<compile_context>
chip_gen: v5e
topology: v5e:2x2
jax: 0.10.0
libtpu: 0.0.40
codegen_flags: <defaults>
</compile_context>

<pallas_src>
import functools

import jax
import jax.numpy as jnp
from jax.experimental import pallas as pl
from jax.experimental.pallas import tpu as pltpu


def channel_attention_kernel(x_ref, w1t_ref, w2t_ref, o_ref,
                             sum_acc, max_acc, *, hw_total, act_type):
    # x_ref:   (1, C, T_HW)  native dtype, one batch element's HW tile
    # w1t_ref: (C, hidden)   fc[0] weight, transposed, fp32
    # w2t_ref: (hidden, C)   fc[2] weight, transposed, fp32
    # o_ref:   (1, 1, C)     lane-dense output block
    # sum_acc / max_acc: (1, C, T_HW) fp32 VMEM scratch
    k = pl.program_id(1)
    nk = pl.num_programs(1)

    @pl.when(k == 0)
    def _init():
        sum_acc[...] = jnp.zeros(sum_acc.shape, sum_acc.dtype)
        max_acc[...] = jnp.full(max_acc.shape, -jnp.inf, max_acc.dtype)

    # Load the tile in its native dtype, upcast in-register.
    xt = x_ref[...].astype(jnp.float32)                     # (1, C, T_HW)
    t_hw = xt.shape[-1]

    if hw_total % t_hw != 0:
        # Tail tile: mask out-of-range spatial positions (0 for sum, -inf for max).
        idx = jax.lax.broadcasted_iota(jnp.int32, xt.shape, 2) + k * t_hw
        valid = idx < hw_total
        x_sum = jnp.where(valid, xt, 0.0)
        x_max = jnp.where(valid, xt, -jnp.inf)
    else:
        x_sum = xt
        x_max = xt

    # Pure VPU elementwise accumulation in the streaming loop.
    sum_acc[...] = sum_acc[...] + x_sum
    max_acc[...] = jnp.maximum(max_acc[...], x_max)

    @pl.when(k == nk - 1)
    def _epilogue():
        # Single cross-lane reduce per accumulator (XLU, once per batch).
        avg = jnp.sum(sum_acc[...], axis=-1) * (1.0 / hw_total)   # (1, C)
        mxx = jnp.max(max_acc[...], axis=-1)                      # (1, C)

        # Fused fc for both pooled vectors: one (2, C) matmul chain.
        pooled = jnp.concatenate([avg, mxx], axis=0)              # (2, C)
        h = jnp.maximum(
            jnp.dot(pooled, w1t_ref[...], preferred_element_type=jnp.float32),
            0.0)                                                  # (2, hidden)
        out2 = jnp.dot(h, w2t_ref[...],
                       preferred_element_type=jnp.float32)        # (2, C)
        out = out2[0:1, :] + out2[1:2, :]                         # (1, C)

        if act_type == 'sigmoid':
            out = jax.nn.sigmoid(out)
        else:
            out = jnp.tanh(out)
        o_ref[...] = out.reshape(o_ref.shape).astype(o_ref.dtype)


def _pick_hw_tile(C, HW, itemsize, budget_bytes=8 << 20):
    """HW tile so that (2x double-buffered input tile + 2x fp32 scratch) <= budget."""
    per_hw = max(1, C * (2 * itemsize + 2 * 4))
    t = (budget_bytes // per_hw) // 128 * 128
    t = max(128, min(t, 2048))
    if t >= HW:
        return HW                      # single full-extent block (no tiling constraint)
    return t                           # multiple of 128


def channel_attention(x_nchw, w1, w2, *, act_type='sigmoid', hw_tile=None):
    """x_nchw: (B, C, H, W); w1: (hidden, C); w2: (C, hidden). Returns (B, C, 1, 1)."""
    B, C, H, W = x_nchw.shape
    hidden = w1.shape[0]
    HW = H * W

    x_flat = x_nchw.reshape(B, C, HW)                 # native dtype, no upcast
    w1t = jnp.transpose(w1).astype(jnp.float32)       # (C, hidden)
    w2t = jnp.transpose(w2).astype(jnp.float32)       # (hidden, C)

    if hw_tile is None:
        t_hw = _pick_hw_tile(C, HW, x_flat.dtype.itemsize)
    else:
        t_hw = min(hw_tile, HW)
        if t_hw < HW and t_hw % 128 != 0:
            raise ValueError("hw_tile must be a multiple of 128 when < H*W")
    nk = pl.cdiv(HW, t_hw)

    kernel = functools.partial(channel_attention_kernel,
                               hw_total=HW, act_type=act_type)

    out = pl.pallas_call(
        kernel,
        out_shape=jax.ShapeDtypeStruct((B, 1, C), jnp.float32),
        grid_spec=pltpu.PrefetchScalarGridSpec(
            num_scalar_prefetch=0,
            grid=(B, nk),
            in_specs=[
                pl.BlockSpec((1, C, t_hw), lambda b, k: (b, 0, k)),
                pl.BlockSpec((C, hidden), lambda b, k: (0, 0)),
                pl.BlockSpec((hidden, C), lambda b, k: (0, 0)),
            ],
            out_specs=pl.BlockSpec((1, 1, C), lambda b, k: (b, 0, 0)),
            scratch_shapes=[
                pltpu.VMEM((1, C, t_hw), jnp.float32),   # running sum
                pltpu.VMEM((1, C, t_hw), jnp.float32),   # running max
            ],
        ),
        compiler_params=pltpu.CompilerParams(
            dimension_semantics=("parallel", "arbitrary")),
    )(x_flat, w1t, w2t)

    # (B, 1, C) -> (B, C, 1, 1): same row-major element order, pure reshape.
    return out.reshape(B, C, 1, 1)


def channel_attention_ref(x_nchw, w1, w2, act_type='sigmoid'):
    """Pure-JAX reference mirroring the PyTorch forward."""
    x = x_nchw.astype(jnp.float32)
    avg = jnp.mean(x, axis=(2, 3))           # (B, C)
    mxx = jnp.max(x, axis=(2, 3))            # (B, C)

    def fc(v):
        h = jnp.maximum(v @ w1.T, 0.0)       # (B, hidden)
        return h @ w2.T                      # (B, C)

    out = fc(avg) + fc(mxx)
    out = jax.nn.sigmoid(out) if act_type == 'sigmoid' else jnp.tanh(out)
    return out.reshape(*out.shape, 1, 1)


if __name__ == "__main__":
    key = jax.random.PRNGKey(0)
    k_x, k_w1, k_w2, k_x2 = jax.random.split(key, 4)

    B, C, H, W = 2, 32, 16, 16
    reduction = 4
    hidden = C // reduction

    x = jax.random.normal(k_x, (B, C, H, W), dtype=jnp.float32)
    # Conv2d(C, hidden, 1, bias=False) weight -> (hidden, C); Conv2d(hidden, C, 1) -> (C, hidden)
    w1 = jax.random.normal(k_w1, (hidden, C), dtype=jnp.float32) * (1.0 / jnp.sqrt(C))
    w2 = jax.random.normal(k_w2, (C, hidden), dtype=jnp.float32) * (1.0 / jnp.sqrt(hidden))

    # Case A: auto tile (single HW block at this small size).
    out_a = jax.block_until_ready(channel_attention(x, w1, w2))
    ref_a = channel_attention_ref(x, w1, w2)
    assert out_a.shape == (B, C, 1, 1), out_a.shape
    assert jnp.allclose(out_a, ref_a, atol=1e-5, rtol=1e-5), "case A mismatch"

    # Case B: force multi-step HW streaming (exercises accumulators + epilogue).
    out_b = jax.block_until_ready(channel_attention(x, w1, w2, hw_tile=128))
    assert jnp.allclose(out_b, ref_a, atol=1e-5, rtol=1e-5), "case B mismatch"

    # Case C: HW not a multiple of the tile -> tail-tile masking path.
    x_c = jax.random.normal(k_x2, (B, C, 13, 11), dtype=jnp.float32)
    out_c = jax.block_until_ready(channel_attention(x_c, w1, w2, hw_tile=128))
    ref_c = channel_attention_ref(x_c, w1, w2)
    assert jnp.allclose(out_c, ref_c, atol=1e-5, rtol=1e-5), "case C mismatch"

    # Case D: bf16 input streamed in native dtype (no wrapper upcast).
    x_bf16 = x.astype(jnp.bfloat16)
    out_d = jax.block_until_ready(channel_attention(x_bf16, w1, w2, hw_tile=128))
    ref_d = channel_attention_ref(x_bf16.astype(jnp.float32), w1, w2)
    assert jnp.allclose(out_d, ref_d, atol=2e-2, rtol=2e-2), "case D mismatch"

    print("KERNEL_OK")
</pallas_src>

<mosaic_0001>
module attributes {stable_mosaic.version = 11 : i64} {
  func.func @channel_attention_kernel(%arg0: i32, %arg1: i32, %arg2: memref<1x32x256xf32, #tpu.memory_space<vmem>>, %arg3: memref<32x8xf32, #tpu.memory_space<vmem>>, %arg4: memref<8x32xf32, #tpu.memory_space<vmem>>, %arg5: memref<1x1x32xf32, #tpu.memory_space<vmem>>, %arg6: memref<1x32x256xf32, #tpu.memory_space<vmem>>, %arg7: memref<1x32x256xf32, #tpu.memory_space<vmem>>) attributes {dimension_semantics = [#tpu.dimension_semantics<parallel>, #tpu.dimension_semantics<arbitrary>], iteration_bounds = array<i64: 2, 1>, scalar_prefetch = 0 : i64, scratch_operands = 2 : i64, tpu.core_type = #tpu.core_type<tc>, window_params = [{transform_indices = @transform_0, window_bounds = array<i64: 1, 32, 256>}, {pipeline_mode = #tpu.pipeline_mode<synchronous>, transform_indices = @transform_1, window_bounds = array<i64: 32, 8>}, {pipeline_mode = #tpu.pipeline_mode<synchronous>, transform_indices = @transform_2, window_bounds = array<i64: 8, 32>}, {transform_indices = @transform_3, window_bounds = array<i64: 1, 1, 32>}]} {
    %c0_i32 = arith.constant 0 : i32
    %0 = arith.cmpi eq, %arg1, %c0_i32 : i32
    %1 = arith.extui %0 : i1 to i32
    %c0_i32_0 = arith.constant 0 : i32
    %2 = arith.cmpi ne, %1, %c0_i32_0 : i32
    scf.if %2 {
      %cst = arith.constant 0.000000e+00 : f32
      %13 = vector.broadcast %cst : f32 to vector<1x32x256xf32>
      %c0_17 = arith.constant 0 : index
      %c0_18 = arith.constant 0 : index
      %c0_19 = arith.constant 0 : index
      %14 = vector.load %arg6[%c0_17, %c0_18, %c0_19] : memref<1x32x256xf32, #tpu.memory_space<vmem>>, vector<1x32x256xf32>
      tpu.vector_store %arg6[%c0_17, %c0_18, %c0_19], %13 {strides = array<i32>} : memref<1x32x256xf32, #tpu.memory_space<vmem>>, vector<1x32x256xf32>,
      %cst_20 = arith.constant 0xFF800000 : f32
      %15 = vector.broadcast %cst_20 : f32 to vector<1x32x256xf32>
      %c0_21 = arith.constant 0 : index
      %c0_22 = arith.constant 0 : index
      %c0_23 = arith.constant 0 : index
      %16 = vector.load %arg7[%c0_21, %c0_22, %c0_23] : memref<1x32x256xf32, #tpu.memory_space<vmem>>, vector<1x32x256xf32>
      tpu.vector_store %arg7[%c0_21, %c0_22, %c0_23], %15 {strides = array<i32>} : memref<1x32x256xf32, #tpu.memory_space<vmem>>, vector<1x32x256xf32>,
    } else {
    }
    %c0 = arith.constant 0 : index
    %c0_1 = arith.constant 0 : index
    %c0_2 = arith.constant 0 : index
    %3 = vector.load %arg2[%c0, %c0_1, %c0_2] : memref<1x32x256xf32, #tpu.memory_space<vmem>>, vector<1x32x256xf32>
    %c0_3 = arith.constant 0 : index
    %c0_4 = arith.constant 0 : index
    %c0_5 = arith.constant 0 : index
    %4 = vector.load %arg6[%c0_3, %c0_4, %c0_5] : memref<1x32x256xf32, #tpu.memory_space<vmem>>, vector<1x32x256xf32>
    %5 = arith.addf %4, %3 : vector<1x32x256xf32>
    %c0_6 = arith.constant 0 : index
    %c0_7 = arith.constant 0 : index
    %c0_8 = arith.constant 0 : index
    %6 = vector.load %arg6[%c0_6, %c0_7, %c0_8] : memref<1x32x256xf32, #tpu.memory_space<vmem>>, vector<1x32x256xf32>
    tpu.vector_store %arg6[%c0_6, %c0_7, %c0_8], %5 {strides = array<i32>} : memref<1x32x256xf32, #tpu.memory_space<vmem>>, vector<1x32x256xf32>,
    %c0_9 = arith.constant 0 : index
    %c0_10 = arith.constant 0 : index
    %c0_11 = arith.constant 0 : index
    %7 = vector.load %arg7[%c0_9, %c0_10, %c0_11] : memref<1x32x256xf32, #tpu.memory_space<vmem>>, vector<1x32x256xf32>
    %8 = arith.maximumf %7, %3 : vector<1x32x256xf32>
    %c0_12 = arith.constant 0 : index
    %c0_13 = arith.constant 0 : index
    %c0_14 = arith.constant 0 : index
    %9 = vector.load %arg7[%c0_12, %c0_13, %c0_14] : memref<1x32x256xf32, #tpu.memory_space<vmem>>, vector<1x32x256xf32>
    tpu.vector_store %arg7[%c0_12, %c0_13, %c0_14], %8 {strides = array<i32>} : memref<1x32x256xf32, #tpu.memory_space<vmem>>, vector<1x32x256xf32>,
    %c0_i32_15 = arith.constant 0 : i32
    %10 = arith.cmpi eq, %arg1, %c0_i32_15 : i32
    %11 = arith.extui %10 : i1 to i32
    %c0_i32_16 = arith.constant 0 : i32
    %12 = arith.cmpi ne, %11, %c0_i32_16 : i32
    scf.if %12 {
      %c0_17 = arith.constant 0 : index
      %c0_18 = arith.constant 0 : index
      %c0_19 = arith.constant 0 : index
      %13 = vector.load %arg6[%c0_17, %c0_18, %c0_19] : memref<1x32x256xf32, #tpu.memory_space<vmem>>, vector<1x32x256xf32>
      %cst = arith.constant dense<0.000000e+00> : vector<1x32xf32>
      %14 = vector.multi_reduction <add>, %13, %cst [2] : vector<1x32x256xf32> to vector<1x32xf32>
      %cst_20 = arith.constant 3.906250e-03 : f32
      %15 = vector.broadcast %cst_20 : f32 to vector<1x32xf32>
      %16 = arith.mulf %14, %15 : vector<1x32xf32>
      %c0_21 = arith.constant 0 : index
      %c0_22 = arith.constant 0 : index
      %c0_23 = arith.constant 0 : index
      %17 = vector.load %arg7[%c0_21, %c0_22, %c0_23] : memref<1x32x256xf32, #tpu.memory_space<vmem>>, vector<1x32x256xf32>
      %cst_24 = arith.constant dense<0xFF800000> : vector<1x32xf32>
      %18 = vector.multi_reduction <maximumf>, %17, %cst_24 [2] : vector<1x32x256xf32> to vector<1x32xf32>
      %19 = tpu.concatenate %16, %18 in 0 : vector<1x32xf32>, vector<1x32xf32> -> vector<2x32xf32>
      %c0_25 = arith.constant 0 : index
      %c0_26 = arith.constant 0 : index
      %20 = vector.load %arg3[%c0_25, %c0_26] : memref<32x8xf32, #tpu.memory_space<vmem>>, vector<32x8xf32>
      %cst_27 = arith.constant dense<0.000000e+00> : vector<2x8xf32>
      %21 = tpu.matmul %19, %20, %cst_27 {dimension_numbers = #tpu.dot_dimension_numbers<[1], [0], [0], [1], [0, 0, 1, 1], [], []>} : vector<2x32xf32>, vector<32x8xf32>, vector<2x8xf32> -> vector<2x8xf32>
      %cst_28 = arith.constant 0.000000e+00 : f32
      %22 = vector.broadcast %cst_28 : f32 to vector<2x8xf32>
      %23 = arith.maximumf %21, %22 : vector<2x8xf32>
      %c0_29 = arith.constant 0 : index
      %c0_30 = arith.constant 0 : index
      %24 = vector.load %arg4[%c0_29, %c0_30] : memref<8x32xf32, #tpu.memory_space<vmem>>, vector<8x32xf32>
      %cst_31 = arith.constant dense<0.000000e+00> : vector<2x32xf32>
      %25 = tpu.matmul %23, %24, %cst_31 {dimension_numbers = #tpu.dot_dimension_numbers<[1], [0], [0], [1], [0, 0, 1, 1], [], []>} : vector<2x8xf32>, vector<8x32xf32>, vector<2x32xf32> -> vector<2x32xf32>
      %26 = vector.extract_strided_slice %25 {offsets = [0, 0], sizes = [1, 32], strides = [1, 1]} : vector<2x32xf32> to vector<1x32xf32>
      %27 = vector.extract_strided_slice %25 {offsets = [1, 0], sizes = [1, 32], strides = [1, 1]} : vector<2x32xf32> to vector<1x32xf32>
      %28 = arith.addf %26, %27 : vector<1x32xf32>
      %29 = arith.negf %28 : vector<1x32xf32>
      %30 = math.exp %29 : vector<1x32xf32>
      %cst_32 = arith.constant 1.000000e+00 : f32
      %31 = vector.broadcast %cst_32 : f32 to vector<1x32xf32>
      %32 = arith.addf %31, %30 : vector<1x32xf32>
      %33 = arith.divf %31, %32 : vector<1x32xf32>
      %34 = vector.shape_cast %33 : vector<1x32xf32> to vector<1x1x32xf32>
      %c0_33 = arith.constant 0 : index
      %c0_34 = arith.constant 0 : index
      %c0_35 = arith.constant 0 : index
      %35 = vector.load %arg5[%c0_33, %c0_34, %c0_35] : memref<1x1x32xf32, #tpu.memory_space<vmem>>, vector<1x1x32xf32>
      tpu.vector_store %arg5[%c0_33, %c0_34, %c0_35], %34 {strides = array<i32>} : memref<1x1x32xf32, #tpu.memory_space<vmem>>, vector<1x1x32xf32>,
    } else {
    }
    return
  }
  func.func @transform_0(%arg0: i32, %arg1: i32) -> (i32, i32, i32) {
    %c0_i32 = arith.constant 0 : i32
    %c0_i32_0 = arith.constant 0 : i32
    return %arg0, %c0_i32, %arg1 : i32, i32, i32
  }
  func.func @transform_1(%arg0: i32, %arg1: i32) -> (i32, i32) {
    %c0_i32 = arith.constant 0 : i32
    %c0_i32_0 = arith.constant 0 : i32
    %c0_i32_1 = arith.constant 0 : i32
    return %c0_i32, %c0_i32_0 : i32, i32
  }
  func.func @transform_2(%arg0: i32, %arg1: i32) -> (i32, i32) {
    %c0_i32 = arith.constant 0 : i32
    %c0_i32_0 = arith.constant 0 : i32
    %c0_i32_1 = arith.constant 0 : i32
    return %c0_i32, %c0_i32_0 : i32, i32
  }
  func.func @transform_3(%arg0: i32, %arg1: i32) -> (i32, i32, i32) {
    %c0_i32 = arith.constant 0 : i32
    %c0_i32_0 = arith.constant 0 : i32
    %c0_i32_1 = arith.constant 0 : i32
    return %arg0, %c0_i32, %c0_i32_0 : i32, i32, i32
  }
}

</mosaic_0001>

<bundles_post_ra>
// kernel: tpu_custom_call.1
= control target key start
LH: loop header
LB: loop body
LE: loop exit
PB: predicated region body
PF: predicated region fallthrough
CT: control target
= control target key end

     0   :  { %8 = vsyncpa [#allocation5], 0  ;;  %s888_s0 = inlined_call_operand.hbm [shape: f32[2,32,256], index: 0, kind: input, shape index: {}]   ;;  %s889_s1 = inlined_call_operand.vmem [shape: f32[32,8], index: 1, kind: input, shape index: {}]   ;;  %s890_s2 = inlined_call_operand.vmem [shape: f32[8,32], index: 2, kind: input, shape index: {}]   ;;  %s891_s3 = inlined_call_operand.hbm [shape: f32[2,1,32], index: 3, kind: output, shape index: {}]  }
   0x1   :  { %10 = vsyncpa [#allocation5 + $0x1], 0 }
   0x2   :  { %11 = vsyncpa [#allocation6], 0 }
   0x3   :  { %13 = vsyncpa [#allocation6 + $0x1], 0  ;;  %s752_s12 = smov 0   ;;  %s754_s13 = smov 0  }
   0x4   :  { %s756_s14 = smov 0   ;;  %s758_s15 = smov 0  }
   0x5   :  { %s760_s16 = smov 0   ;;  %s762_s17 = smov 0  }
   0x6 LB: > { %s533_s18 = sadd.s32 4294967295, %s728_s17   ;;  %s534_s19 = sadd.s32 4294967294, %s728_s17   ;;  %s728_s17 = sphi %s762_s17, %s19_s17   ;;  %s724_s16 = sphi %s760_s16, %s900_s16   ;;  %s720_s15 = sphi %s758_s15, %s899_s15   ;;  %s716_s14 = sphi %s756_s14, %s898_s14   ;;  %s712_s13 = sphi %s754_s13, %s897_s13   ;;  %s708_s12 = sphi %s752_s12, %s896_s12  }
   0x7   : > { %s31_s20 = sadd.s32 1, %s724_s16  ;;  %s40_s21 = sadd.s32 1, %s716_s14 }
   0x8   : > { %p33_p0 = scmp.ge.s32.totalorder %s31_s20, 2  ;;  %p47_p1 = scmp.ne.s32.totalorder %s716_s14, %s712_s13 }
   0x9   : > { %p48_p2 = scmp.eq.s32.totalorder %s728_s17, 0  ;;  %p53_p3 = scmp.ne.s32.totalorder %s712_s13, %s708_s12 }
   0xa   : > { %s902_s20 = smov (%p33_p0, %s31_s20), 0  ;;  %p54_p5 = scmp.eq.s32.totalorder %s533_s18, 0 }
   0xb   : > { %p793_p4 = por %p48_p2, %p47_p1  ;;  %s35_s23 = ssub.s32 %s724_s16, %s902_s20 }
   0xc   : > { %p119_p6 = scmp.eq.s32.totalorder %s533_s18, 1  ;;  %p38_p7 = scmp.eq.s32.totalorder %s35_s23, 0 }
   0xd   : > { %p799_p8 = por %p54_p5, %p53_p3  ;;  %p125_p10 = scmp.eq.s32.totalorder %s534_s19, 1 }
   0xe   : > { %p803_p9 = por %p119_p6, %p47_p1  ;;  %p536_p12 = scmp.ge.s32.totalorder %s728_s17, 2 }
   0xf   : > { %s808_s26 = scalar_select %p38_p7, %s716_s14, %s40_s21  }
  0x10   : > { %p810_p11 = por %p125_p10, %p53_p3  ;;  %p560_p13 = scmp.lt.s32.totalorder %s728_s17, 2 }
  0x11   : > { %s151_s28 = sand.u32 1, %s716_s14   ;;  %s547_s30 = sshll.u32 %s724_s16, 6 }
  0x12   : > { %s537_s29 = sshll.u32 %s151_s28, 6  ;;  %s162_s6 = scalar_lea.hbm %s888_s0, %s547_s30 }
  0x13   : > { %s155_s7 = scalar_lea.vmem [#allocation4], %s537_s29  ;;  %s163_s9 = sshll.u32 %s162_s6, 4  ;;  %s164_s9 = int_to_ptr.hbm [resolvable:$true] %s163_s9 }
  0x14   : > { %s165_s8 = sshll.u32 %s155_s7, 4  ;;  %p553_p0 = pnand %p560_p13, %p793_p4  ;;  %s166_s8 = int_to_ptr.vmem [resolvable:$true] %s165_s8 }
  0x15   : > { %p540_p1 = scmp.ge.s32.totalorder %s728_s17, 1  ;;  %s152_s10 = scalar_lea.sflag [#allocation5], %s151_s28 }
  0x16   : > { %s730_s11 = smov 256   ;;  %s731_s18 = smov 16  }
  0x17   : > { %555 = dma.hbm_to_vmem [thread:$0]  (!%p553_p0), %s164_s9, 1024, %s166_s8, %s152_s10, %s730_s11, %s730_s11, %s731_s18  }
  0x18   : > { %p173_p2 = scmp.lt.s32.totalorder %s728_s17, 3 }
  0x1a   : > { %p174_p3 = pnand %p540_p1, %p173_p2 }
  0x1b   : > { %s826_s19 = sand.u32 (!%p174_p3), 1, %s712_s13  }
  0x1c   : > { %177 = sbr.rel (%p174_p3) target bundleno = 463 (0x1cf), region = 32  ;;  %s541_s21 = sshll.u32 (!%p174_p3), %s826_s19, 6 }
  0x1d   : > { %s180_s23 = scalar_lea.sflag (!%p174_p3), [#allocation5], %s826_s19  ;;  %s183_s29 = scalar_lea.vmem (!%p174_p3), [#allocation4], %s541_s21 }
  0x21   : > { %699 = dma.done.wait (%p799_p8), %s180_s23, 1024  }
  0x22   : > { %701 = vsyncadd (%p799_p8), %s180_s23, 4294966272  ;;  %v227_v0 = vld [vmem:[%s183_s29] sm:$0xff]  ;;  %v228_v1 = vld [vmem:[%s183_s29 + $0x8] sm:$0xff]  ;;  %v334_v23 = vlaneseq  ;;  %vm339_vm0 = vcmask 130112   ;;  %vm343_vm1 = vcmask 195712   ;;  %vm347_vm2 = vcmask 261312   ;;  %s452_s18 = scalar_lea.hbm %s891_s3, %s720_s15 }
  0x23   : > { %v231_v2 = vld [vmem:[%s183_s29 + $0x20] sm:$0xff]  ;;  %v318_v3 = vmax.f32 %v227_v0, %v228_v1  ;;  %v294_v4 = vadd.f32 %v228_v1, %v227_v0  ;;  %v232_v5 = vld [vmem:[%s183_s29 + $0x28] sm:$0xff]  ;;  %v229_v7 = vld [vmem:[%s183_s29 + $0x10] sm:$0xff]  ;;  %vm362_vm3 = vcmask 1040384   ;;  %vm368_vm4 = vcmask 261120   ;;  %s205_s21 = scalar_lea.vmem [#allocation7], %s826_s19 }
  0x24   : > { %v300_v6 = vadd.f32 %v232_v5, %v231_v2  ;;  %v230_v8 = vld [vmem:[%s183_s29 + $0x18] sm:$0xff]  ;;  %v233_v9 = vld [vmem:[%s183_s29 + $0x30] sm:$0xff]  ;;  %v324_v14 = vmax.f32 %v231_v2, %v232_v5  ;;  %v365_v18 = vld [vmem:[%s889_s1 + $0x8] sm:$0xff]  ;;  %v335_v24 = vand.u32 127, %v334_v23  ;;  %vm394_vm5 = vcmask 64512   ;;  %s454_s23 = sshll.u32 %s205_s21, 4  ;;  %s455_s23 = int_to_ptr.vmem [resolvable:$true] %s454_s23 }
  0x25   : > { %319 = vmax.xlane.f32.xlu2 %v318_v3  ;;  %295 = vadd.xlane.f32.xlu0 %v294_v4  ;;  %v234_v10 = vld [vmem:[%s183_s29 + $0x38] sm:$0xff]  ;;  %v321_v11 = vmax.f32 %v229_v7, %v230_v8  ;;  %v297_v12 = vadd.f32 %v230_v8, %v229_v7  ;;  %v366_v17 = vld [vmem:[%s889_s1 + $0x10] sm:$0xff]  ;;  %v364_v19 = vld [vmem:[%s889_s1] sm:$0xff]  ;;  %s456_s29 = sshll.u32 %s452_s18, 4  ;;  %vm441_vm9 = vcmask 253952   ;;  %s444_s15 = scalar_lea.sflag [#allocation6], %s826_s19  ;;  %s457_s29 = int_to_ptr.hbm [resolvable:$true] %s456_s29 }
  0x26   : > { %301 = vadd.xlane.f32.xlu1 %v300_v6  ;;  %v303_v13 = vadd.f32 %v234_v10, %v233_v9  ;;  %v327_v15 = vmax.f32 %v233_v9, %v234_v10  ;;  %v367_v16 = vld [vmem:[%s889_s1 + $0x18] sm:$0xff]  ;;  %v337_v27 = vadd.s32 4294967288, %v335_v24  ;;  %v341_v30 = vadd.s32 4294967280, %v335_v24  ;;  %v393_v52 = vld [vmem:[%s890_s2] sm:$0xff]  ;;  %s660_s22 = sshra.s32 %s457_s29, 4  ;;  %s666_s4 = scalar_lea.hbm %s891_s3, 2  ;;  %s661_s22 = int_to_ptr.hbm [resolvable:$true] %s660_s22 }
  0x27   : > { %384 = vmatpush.msra.mxu0 %v367_v16  ;;  %v345_v35 = vadd.s32 4294967272, %v335_v24  ;;  %413 = vmatpush.msra.mxu1 %v393_v52  ;;  %s662_s24 = scalar_lea.hbm %s661_s22, 1  ;;  %p667_p7 = scmp.lt.s32.totalorder %s661_s22, %s891_s3 }
  0x28   : > { %p663_p4 = scmp.ne.s32.totalorder %s661_s22, %s662_s24  ;;  %p668_p8 = scmp.lt.s32.totalorder %s666_s4, %s662_s24 }
  0x29   : > { %385 = vmatpush.msra.mxu0 %v366_v17 }
  0x2a   : > { %p664_p5 = pnand %p663_p4, %p803_p9  ;;  %p669_p10 = por %p668_p8, %p667_p7 }
  0x2b   : > { %386 = vmatpush.msra.mxu0 %v365_v18 }
  0x2c   : > { %p665_p6 = pneg %p664_p5 }
  0x2d   : > { %322 = vmax.xlane.f32.xlu2 %v321_v11  ;;  %298 = vadd.xlane.f32.xlu0 %v297_v12 }
  0x2e   : > { %304 = vadd.xlane.f32.xlu1 %v303_v13  ;;  %387 = vmatpush.msra.mxu0 %v364_v19  ;;  %p670_p13 = pnand %p669_p10, %p665_p6 }
  0x35   : > { %325 = vmax.xlane.f32.xlu0 %v324_v14 }
  0x36   : > { %328 = vmax.xlane.f32.xlu1 %v327_v15 }
  0x98   : > { %v296_v20 = vpop.xlane.xlu0 %295  ;;  %v320_v21 = vpop.xlane.xlu2 %319 }
  0x99   : > { %v302_v22 = vpop.xlane.xlu1 %301  ;;  %v306_v25 = vmul.f32 0.00390625, %v296_v20  ;;  %v354_v37 = vperm.slane %v320_v21, %v335_v24 }
  0x9a   : > { %v308_v31 = vmul.f32 0.00390625, %v302_v22 }
  0x9b   : > { %v336_v34 = vperm.slane %v306_v25, %v335_v24 }
  0x9c   : > { %v342_v40 = vperm.slane %v308_v31, %v341_v30 }
  0xa0   : > { %v299_v26 = vpop.xlane.xlu0 %298  ;;  %v323_v32 = vpop.xlane.xlu2 %322 }
  0xa1   : > { %v307_v28 = vmul.f32 0.00390625, %v299_v26  ;;  %v305_v29 = vpop.xlane.xlu1 %304  ;;  %v355_v38 = vperm.slane %v323_v32, %v337_v27 }
  0xa2   : > { %v309_v36 = vmul.f32 0.00390625, %v305_v29 }
  0xa3   : > { %v338_v33 = vperm.slane %v307_v28, %v337_v27  ;;  %v356_v46 = vsel %vm339_vm0, %v355_v38, %v354_v37 }
  0xa4   : > { %v346_v41 = vperm.slane %v309_v36, %v345_v35 }
  0xa5   : > { %v340_v39 = vsel %vm339_vm0, %v338_v33, %v336_v34 }
  0xa6   : > { %v344_v45 = vsel %vm343_vm1, %v342_v40, %v340_v39 }
  0xa7   : > { %v348_v49 = vsel %vm347_vm2, %v346_v41, %v344_v45 }
  0xa8   : > { %v326_v42 = vpop.xlane.xlu0 %325 }
  0xa9   : > { %v357_v43 = vperm.slane %v326_v42, %v341_v30  ;;  %v329_v44 = vpop.xlane.xlu1 %328 }
  0xaa   : > { %v359_v47 = vperm.slane %v329_v44, %v345_v35 }
  0xab   : > { %v358_v48 = vsel %vm343_vm1, %v357_v43, %v356_v46 }
  0xac   : > { %v360_v50 = vsel %vm347_vm2, %v359_v47, %v358_v48 }
  0xad   : > { %v363_v51 = vsel %vm362_vm3, %v348_v49, %v360_v50 }
  0xae   : > { %542 = vmatmul.msk.f32.vlgmr.msra.gmra.mxu0 %vm368_vm4, %v363_v51 }
 0x12b   : > { %v389_v53 = vpop.f32.mrf.mxu0 }
 0x12c   : > { %v392_v54 = vmax.f32 %v389_v53, 0.0 }
 0x12e   : > { %543 = vmatmul.msk.f32.vlgmr.msra.gmra.mxu1 %vm394_vm5, %v392_v54 }
 0x1ab   : > { %v415_v55 = vpop.f32.mrf.mxu1 }
 0x1ac   : > { %v419_v56 = vrot.slane %v415_v55, 1 }
 0x1ae   : > { %v421_v57 = vadd.f32 %v419_v56, %v415_v55 }
 0x1b0   : > { %v544_v58 = vmul.f32 -1.442695, %v421_v57 }
 0x1b2   : > { %612 = vpow2.f32 %v544_v58 }
 0x1b8   : > { %v613_v59 = vpop.eup %612 }
 0x1b9   : > { %v425_v60 = vadd.f32 1.0, %v613_v59 }
 0x1bb   : > { %614 = vrcp.f32 %v425_v60  ;;  %v437_v0 = vand.u32 2147483648, %v425_v60  ;;  %v435_v2 = vand.u32 2147483647, %v425_v60  ;;  %vm431_vm7 = vweird.f32 %v425_v60 }
 0x1bd   : > { %v438_v4 = vor.u32 1.1754944e-38, %v437_v0  ;;  %vm436_vm10 = vcmp.eq.f32.partialorder %v435_v2, 8.507059e+37 }
 0x1c1   : > { %v615_v61 = vpop.eup %614 }
 0x1c2   : > { %v427_v62 = vmul.f32 %v615_v61, %v425_v60  ;;  %vm432_vm6 = vweird.f32 %v615_v61 }
 0x1c3   : > { %vm433_vm8 = vmor %vm431_vm7, %vm432_vm6 }
 0x1c4   : > { %v428_v63 = vsub.f32 1.0, %v427_v62 }
 0x1c6   : > { %v429_v1 = vmul.f32 %v615_v61, %v428_v63 }
 0x1c8   : > { %v430_v3 = vadd.f32 %v615_v61, %v429_v1 }
 0x1ca   : > { %v434_v5 = vsel %vm433_vm8, %v615_v61, %v430_v3 }
 0x1cb   : > { %v439_v6 = vsel %vm436_vm10, %v438_v4, %v434_v5 }
 0x1cc   : > { %442 = vst.msk [vmem:[%s205_s21] sm:$0x1] %vm441_vm9, %v439_v6 }
 0x1cd   : > { %673 = shalt.err (!%p670_p13)
}
 0x1ce   : > { %550 = dma.vmem_to_hbm [thread:$0]  (%p803_p9), %s455_s23, 16, %s457_s29, %s444_s15  }
 0x1cf PF: > { %s468_s19 = sand.u32 1, %s708_s12   ;;  %p557_p0 = pnand %p536_p12, %p810_p11 }
 0x1d0   : > { %s469_s7 = scalar_lea.sflag [#allocation6], %s468_s19 }
 0x1d1   : > { %p558_p1 = pneg %p557_p0 }
 0x1d3   : > { %703 = dma.done.wait (%p558_p1), %s469_s7, 16  }
 0x1d4   : > { %705 = vsyncadd (%p558_p1), %s469_s7, 4294967280  ;;  %s19_s17 = sadd.s32 1, %s728_s17   ;;  %s896_s12 = smov %s712_s13 }
 0x1d5   : > { %p16_p2 = scmp.ge.s32.totalorder %s19_s17, 4   ;;  %s897_s13 = smov %s716_s14 }
 0x1d6   : > { %s898_s14 = smov %s808_s26  ;;  %s899_s15 = smov %s724_s16 }
 0x1d7   : > { %s900_s16 = smov %s902_s20  ;;  %18 = sbr.rel (!%p16_p2) target bundleno = 6 (0x6), region = 85 }
 0x1dc   :  { %474 = vsyncpa [#allocation5], 1 }
 0x1dd   :  { %476 = vsyncpa [#allocation5 + $0x1], 1 }
 0x1de   :  { %477 = vsyncpa [#allocation6], 1 }
 0x1df   :  { %479 = vsyncpa [#allocation6 + $0x1], 1 }

</bundles_post_ra>
